<compile_context>
chip_gen: v6e
topology: v6e:2x2x1
jax: 0.10.0
libtpu: 0.0.40
codegen_flags: <defaults>
</compile_context>

<pallas_src>
import jax
import jax.numpy as jnp
from jax.experimental import pallas as pl
from jax.experimental.pallas import tpu as pltpu

LANE = 128      # lane width of a vreg
SUBLANE = 8     # sublane count of a vreg


def _round_up(n, m):
    return ((n + m - 1) // m) * m


def shallow_mlp_kernel(x_ref, w1_ref, b1_ref, w2_ref, b2_ref, o_ref):
    # Cast activations to bf16 for the MXU; accumulate in f32.
    x = x_ref[...].astype(jnp.bfloat16)

    # hidden = relu(x @ W1 + b1)   (bias-add / ReLU epilogue in f32)
    h = jnp.dot(x, w1_ref[...], preferred_element_type=jnp.float32)
    h = jnp.maximum(h + b1_ref[...], 0.0)

    # out = h @ W2 + b2   (cast hidden to bf16 right away to bound the f32 temp)
    out = jnp.dot(h.astype(w2_ref.dtype), w2_ref[...],
                  preferred_element_type=jnp.float32)
    o_ref[...] = (out + b2_ref[...]).astype(o_ref.dtype)


def prepare_params(w1, b1, w2, b2, compute_dtype=jnp.bfloat16):
    """One-time parameter prep (do NOT call per forward):
    torch layout (out, in) -> (in, out), zero-pad the *hidden* dim to a
    multiple of 128 lanes, cast weights to bf16. Biases stay f32. The padded
    hidden columns are exactly zero (w1/b1 pad = 0, w2 pad rows = 0), so they
    contribute nothing to the result. The output dim is NOT padded.
    """
    # TODO(synk): on v7x, consider compute_dtype=fp8 for the weights (MXU fp8
    # path); not portable to v5e/v6e so it is not enabled here.
    hidden, in_features = w1.shape
    out_features = w2.shape[0]
    hp = _round_up(hidden, LANE)

    w1_t = jnp.zeros((in_features, hp), compute_dtype)
    w1_t = w1_t.at[:, :hidden].set(w1.T.astype(compute_dtype))
    b1_p = jnp.zeros((1, hp), jnp.float32).at[:, :hidden].set(
        b1.astype(jnp.float32))

    w2_t = jnp.zeros((hp, out_features), compute_dtype)
    w2_t = w2_t.at[:hidden, :].set(w2.T.astype(compute_dtype))
    b2_p = b2.astype(jnp.float32).reshape(1, out_features)

    return w1_t, b1_p, w2_t, b2_p


def _pick_tile_and_vmem(B, In, Hp, Of):
    """Pick the batch tile from the per-generation VMEM capacity.
    All math is on static Python ints (runs at trace time)."""
    try:
        vmem_cap = int(pltpu.get_tpu_info().vmem_capacity_bytes)
    except Exception:
        vmem_cap = 64 << 20          # v7x worst case
    # Leave headroom for compiler-internal scratch; never request > 100 MiB.
    vmem_limit = int(min((vmem_cap * 3) // 4, 100 << 20))

    # Resident (single-buffered) weights + biases.
    weight_bytes = In * Hp * 2 + Hp * Of * 2 + Hp * 4 + Of * 4
    # Per-batch-row bytes: x f32 double-buffer + its bf16 in-kernel copy,
    # out f32 double-buffer, f32 hidden + bf16 hidden copy.
    per_row = 2 * In * 4 + In * 2 + 2 * Of * 4 + Hp * 6

    budget = max(vmem_limit // 2 - weight_bytes, per_row * SUBLANE)
    tb_cap = max((budget // per_row) // SUBLANE * SUBLANE, SUBLANE)
    tb_cap = min(tb_cap, 1024)

    if B <= tb_cap:
        if B >= 256:
            # Split into two tiles so both v7x TensorCores get work.
            tb = _round_up(pl.cdiv(B, 2), SUBLANE)
        else:
            tb = B               # single block == full array dim -> legal
    else:
        tb = tb_cap
    return tb, vmem_limit


@jax.jit
def shallow_forward(x, w1_t, b1_p, w2_t, b2_p):
    """x: (B, In) f32.  Prepared params from prepare_params()."""
    B, In = x.shape
    Hp = w1_t.shape[1]
    Of = w2_t.shape[1]

    TB, vmem_limit = _pick_tile_and_vmem(B, In, Hp, Of)
    grid = (pl.cdiv(B, TB),)          # last block may be ragged; Pallas masks it
    resident = pl.Buffered(1)         # constant index_map -> single buffer

    return pl.pallas_call(
        shallow_mlp_kernel,
        out_shape=jax.ShapeDtypeStruct((B, Of), jnp.float32),
        grid=grid,
        in_specs=[
            pl.BlockSpec((TB, In), lambda i: (i, 0)),                    # x tile
            pl.BlockSpec((In, Hp), lambda i: (0, 0), pipeline_mode=resident),
            pl.BlockSpec((1, Hp), lambda i: (0, 0), pipeline_mode=resident),
            pl.BlockSpec((Hp, Of), lambda i: (0, 0), pipeline_mode=resident),
            pl.BlockSpec((1, Of), lambda i: (0, 0), pipeline_mode=resident),
        ],
        out_specs=pl.BlockSpec((TB, Of), lambda i: (i, 0)),
        compiler_params=pltpu.CompilerParams(
            dimension_semantics=("parallel",),
            vmem_limit_bytes=vmem_limit),
    )(x, w1_t, b1_p, w2_t, b2_p)


def init_params(key, input_layer, hidden_layer, output_layer):
    """Deterministic init mimicking torch.nn.Linear default:
    U(-1/sqrt(fan_in), 1/sqrt(fan_in)) for both weight and bias."""
    k1, k2, k3, k4 = jax.random.split(key, 4)
    bound1 = 1.0 / jnp.sqrt(jnp.float32(input_layer))
    bound2 = 1.0 / jnp.sqrt(jnp.float32(hidden_layer))
    w1 = jax.random.uniform(k1, (hidden_layer, input_layer), jnp.float32,
                            -bound1, bound1)
    b1 = jax.random.uniform(k2, (hidden_layer,), jnp.float32, -bound1, bound1)
    w2 = jax.random.uniform(k3, (output_layer, hidden_layer), jnp.float32,
                            -bound2, bound2)
    b2 = jax.random.uniform(k4, (output_layer,), jnp.float32, -bound2, bound2)
    return w1, b1, w2, b2


def _reference(x, w1, b1, w2, b2):
    return jnp.maximum(x @ w1.T + b1, 0.0) @ w2.T + b2


if __name__ == "__main__":
    # Small shapes consistent with the module's forward: x is (batch, input_layer).
    batch, input_layer, hidden_layer, output_layer = 8, 32, 64, 16

    key = jax.random.PRNGKey(0)
    kx, kp, kx2 = jax.random.split(key, 3)
    x = jax.random.normal(kx, (batch, input_layer), jnp.float32)
    w1, b1, w2, b2 = init_params(kp, input_layer, hidden_layer, output_layer)

    # One-time parameter prep (transpose / pad hidden dim / cast) — off hot path.
    w1_t, b1_p, w2_t, b2_p = prepare_params(w1, b1, w2, b2)

    out = shallow_forward(x, w1_t, b1_p, w2_t, b2_p)
    out = jax.block_until_ready(out)

    ref = _reference(x, w1, b1, w2, b2)
    assert out.shape == (batch, output_layer)
    # bf16 matmuls with f32 accumulation -> loosened tolerance vs f32 reference.
    assert jnp.allclose(out, ref, atol=2e-2, rtol=2e-2), (
        float(jnp.max(jnp.abs(out - ref))))

    # Second check: larger, non-tile-multiple batch exercises the two-tile
    # "parallel" path and the ragged last block (masked output writes).
    x2 = jax.random.normal(kx2, (300, input_layer), jnp.float32)
    out2 = jax.block_until_ready(shallow_forward(x2, w1_t, b1_p, w2_t, b2_p))
    ref2 = _reference(x2, w1, b1, w2, b2)
    assert out2.shape == (300, output_layer)
    assert jnp.allclose(out2, ref2, atol=2e-2, rtol=2e-2), (
        float(jnp.max(jnp.abs(out2 - ref2))))

    print("KERNEL_OK")
</pallas_src>

<mosaic_0001>
module attributes {stable_mosaic.version = 11 : i64} {
  func.func @shallow_mlp_kernel(%arg0: i32, %arg1: memref<8x32xf32, #tpu.memory_space<vmem>>, %arg2: memref<32x128xbf16, #tpu.memory_space<vmem>>, %arg3: memref<1x128xf32, #tpu.memory_space<vmem>>, %arg4: memref<128x16xbf16, #tpu.memory_space<vmem>>, %arg5: memref<1x16xf32, #tpu.memory_space<vmem>>, %arg6: memref<8x16xf32, #tpu.memory_space<vmem>>) attributes {dimension_semantics = [#tpu.dimension_semantics<parallel>], iteration_bounds = array<i64: 1>, scalar_prefetch = 0 : i64, scratch_operands = 0 : i64, tpu.core_type = #tpu.core_type<tc>, window_params = [{transform_indices = @transform_0, window_bounds = array<i64: 8, 32>}, {pipeline_mode = #tpu.pipeline_mode<synchronous>, transform_indices = @transform_1, window_bounds = array<i64: 32, 128>}, {pipeline_mode = #tpu.pipeline_mode<synchronous>, transform_indices = @transform_2, window_bounds = array<i64: 1, 128>}, {pipeline_mode = #tpu.pipeline_mode<synchronous>, transform_indices = @transform_3, window_bounds = array<i64: 128, 16>}, {pipeline_mode = #tpu.pipeline_mode<synchronous>, transform_indices = @transform_4, window_bounds = array<i64: 1, 16>}, {transform_indices = @transform_5, window_bounds = array<i64: 8, 16>}]} {
    %c0 = arith.constant 0 : index
    %c0_0 = arith.constant 0 : index
    %0 = vector.load %arg1[%c0, %c0_0] : memref<8x32xf32, #tpu.memory_space<vmem>>, vector<8x32xf32>
    %1 = arith.truncf %0 : vector<8x32xf32> to vector<8x32xbf16>
    %c0_1 = arith.constant 0 : index
    %c0_2 = arith.constant 0 : index
    %2 = vector.load %arg2[%c0_1, %c0_2] : memref<32x128xbf16, #tpu.memory_space<vmem>>, vector<32x128xbf16>
    %cst = arith.constant dense<0.000000e+00> : vector<8x128xf32>
    %3 = tpu.matmul %1, %2, %cst {dimension_numbers = #tpu.dot_dimension_numbers<[1], [0], [0], [1], [0, 0, 1, 1], [], []>} : vector<8x32xbf16>, vector<32x128xbf16>, vector<8x128xf32> -> vector<8x128xf32>
    %c0_3 = arith.constant 0 : index
    %c0_4 = arith.constant 0 : index
    %4 = vector.load %arg3[%c0_3, %c0_4] : memref<1x128xf32, #tpu.memory_space<vmem>>, vector<1x128xf32>
    %5 = vector.broadcast %4 : vector<1x128xf32> to vector<8x128xf32>
    %6 = arith.addf %3, %5 : vector<8x128xf32>
    %cst_5 = arith.constant 0.000000e+00 : f32
    %7 = vector.broadcast %cst_5 : f32 to vector<8x128xf32>
    %8 = arith.maximumf %6, %7 : vector<8x128xf32>
    %9 = arith.truncf %8 : vector<8x128xf32> to vector<8x128xbf16>
    %c0_6 = arith.constant 0 : index
    %c0_7 = arith.constant 0 : index
    %10 = vector.load %arg4[%c0_6, %c0_7] : memref<128x16xbf16, #tpu.memory_space<vmem>>, vector<128x16xbf16>
    %cst_8 = arith.constant dense<0.000000e+00> : vector<8x16xf32>
    %11 = tpu.matmul %9, %10, %cst_8 {dimension_numbers = #tpu.dot_dimension_numbers<[1], [0], [0], [1], [0, 0, 1, 1], [], []>} : vector<8x128xbf16>, vector<128x16xbf16>, vector<8x16xf32> -> vector<8x16xf32>
    %c0_9 = arith.constant 0 : index
    %c0_10 = arith.constant 0 : index
    %12 = vector.load %arg5[%c0_9, %c0_10] : memref<1x16xf32, #tpu.memory_space<vmem>>, vector<1x16xf32>
    %13 = vector.broadcast %12 : vector<1x16xf32> to vector<8x16xf32>
    %14 = arith.addf %11, %13 : vector<8x16xf32>
    %c0_11 = arith.constant 0 : index
    %c0_12 = arith.constant 0 : index
    %15 = vector.load %arg6[%c0_11, %c0_12] : memref<8x16xf32, #tpu.memory_space<vmem>>, vector<8x16xf32>
    tpu.vector_store %arg6[%c0_11, %c0_12], %14 {strides = array<i32>} : memref<8x16xf32, #tpu.memory_space<vmem>>, vector<8x16xf32>,
    return
  }
  func.func @transform_0(%arg0: i32) -> (i32, i32) {
    %c0_i32 = arith.constant 0 : i32
    %c0_i32_0 = arith.constant 0 : i32
    return %arg0, %c0_i32 : i32, i32
  }
  func.func @transform_1(%arg0: i32) -> (i32, i32) {
    %c0_i32 = arith.constant 0 : i32
    %c0_i32_0 = arith.constant 0 : i32
    %c0_i32_1 = arith.constant 0 : i32
    return %c0_i32, %c0_i32_0 : i32, i32
  }
  func.func @transform_2(%arg0: i32) -> (i32, i32) {
    %c0_i32 = arith.constant 0 : i32
    %c0_i32_0 = arith.constant 0 : i32
    %c0_i32_1 = arith.constant 0 : i32
    return %c0_i32, %c0_i32_0 : i32, i32
  }
  func.func @transform_3(%arg0: i32) -> (i32, i32) {
    %c0_i32 = arith.constant 0 : i32
    %c0_i32_0 = arith.constant 0 : i32
    %c0_i32_1 = arith.constant 0 : i32
    return %c0_i32, %c0_i32_0 : i32, i32
  }
  func.func @transform_4(%arg0: i32) -> (i32, i32) {
    %c0_i32 = arith.constant 0 : i32
    %c0_i32_0 = arith.constant 0 : i32
    %c0_i32_1 = arith.constant 0 : i32
    return %c0_i32, %c0_i32_0 : i32, i32
  }
  func.func @transform_5(%arg0: i32) -> (i32, i32) {
    %c0_i32 = arith.constant 0 : i32
    %c0_i32_0 = arith.constant 0 : i32
    return %arg0, %c0_i32 : i32, i32
  }
}

</mosaic_0001>

<bundles_post_ra>
// kernel: shallow_forward.1
= control target key start
LH: loop header
LB: loop body
LE: loop exit
PB: predicated region body
PF: predicated region fallthrough
CT: control target
= control target key end

     0   :  { %v308_v1 = vmov 0.0   ;;  %vm309_vm0 = vmmov 0   ;;  %vm47_vm1 = vcmask 261120   ;;  %s383_s0 = inlined_call_operand.vmem [shape: f32[8,32], index: 0, kind: input, shape index: {}]   ;;  %s384_s1 = inlined_call_operand.vmem [shape: bf16[32,128], index: 1, kind: input, shape index: {}]   ;;  %s385_s2 = inlined_call_operand.vmem [shape: f32[1,128], index: 2, kind: input, shape index: {}]   ;;  %s386_s3 = inlined_call_operand.vmem [shape: bf16[128,16], index: 3, kind: input, shape index: {}]   ;;  %s387_s4 = inlined_call_operand.vmem [shape: f32[1,16], index: 4, kind: input, shape index: {}]   ;;  %s388_s5 = inlined_call_operand.hbm [shape: f32[8,16], index: 5, kind: output, shape index: {}]  }
   0x1   :  { %v276_v0 = vld [vmem:[%s384_s1 + $0x8] sm:$0xff]   ;;  %245 = vmatprep.subr.bf16.mxu0 %v308_v1  ;;  %v277_v2 = vld [vmem:[%s384_s1] sm:$0xff]   ;;  %253 = vmatprep.subr.bf16.mxu1 %v308_v1  ;;  %v278_v4 = vld [vmem:[%s386_s3 + $0x38] sm:$0xff]  }
   0x2   :  { %246 = vmatpush3.bf16.msra.mxu0 %v276_v0  ;;  %249 = vmatprep.mubr.msk.bf16.mxu0 %vm309_vm0, %v308_v1  ;;  %v22_v3 = vld [vmem:[%s383_s0] sm:$0xff]  ;;  %v279_v6 = vld [vmem:[%s386_s3 + $0x30] sm:$0xff]   ;;  %v280_v7 = vld [vmem:[%s386_s3 + $0x28] sm:$0xff]  }
   0x3   :  { %247 = vmatprep.subr.bf16.mxu0 %v308_v1  ;;  %269 = vmatprep.mubr.msk.bf16.mxu1 %vm309_vm0, %v308_v1  ;;  %v23_v5 = vpack.c.bf16 %v22_v3, %v22_v3 }
   0x4   :  { %254 = vmatpush3.bf16.msra.mxu1 %v278_v4 }
   0x5   :  { %255 = vmatprep.subr.bf16.mxu1 %v308_v1 }
   0x6   :  { %248 = vmatpush3.bf16.msra.mxu0 %v277_v2 }
   0x8   :  { %256 = vmatpush3.bf16.msra.mxu1 %v279_v6 }
   0x9   :  { %250 = vmatmul.mubr.msk.bf16.vlgmr.msra.gmra.mxu0 %vm47_vm1, %v23_v5  ;;  %257 = vmatprep.subr.bf16.mxu1 %v308_v1 }
   0xa   :  { %10 = vsyncpa [#allocation3], 0  ;;  %v281_v8 = vld [vmem:[%s386_s3 + $0x20] sm:$0xff]   ;;  %v282_v9 = vld [vmem:[%s386_s3 + $0x18] sm:$0xff]   ;;  %s310_s17 = smov [#allocation2]   ;;  %vm204_vm2 = vcmask 130048  }
   0xb   :  { %v283_v10 = vld [vmem:[%s386_s3 + $0x10] sm:$0xff]   ;;  %v284_v11 = vld [vmem:[%s386_s3 + $0x8] sm:$0xff]   ;;  %v285_v12 = vld [vmem:[%s386_s3] sm:$0xff]   ;;  %s212_s18 = sshll.u32 %s310_s17, 4  ;;  %s213_s18 = int_to_ptr.vmem [resolvable:$true] %s212_s18 }
   0xc   :  { %258 = vmatpush3.bf16.msra.mxu1 %v280_v7  ;;  %v220_v13 = vld [vmem:[%s385_s2] ss:$0 sm:$0xff]  ;;  %s286_s2 = scalar_lea.vmem %s213_s18, 128  ;;  %p291_p1 = scmp.lt.s32.totalorder %s213_s18, %s213_s18 }
   0xd   :  { %259 = vmatprep.subr.bf16.mxu1 %v308_v1  ;;  %v224_v21 = vld [vmem:[%s387_s4] ss:$0 sm:$0xff]  ;;  %p287_p0 = scmp.ne.s32.totalorder %s213_s18, %s286_s2  ;;  %p292_p2 = scmp.lt.s32.totalorder %s286_s2, %s286_s2 }
   0xf   :  { %p293_p3 = por %p292_p2, %p291_p1 }
  0x10   :  { %260 = vmatpush3.bf16.msra.mxu1 %v281_v8 }
  0x11   :  { %261 = vmatprep.subr.bf16.mxu1 %v308_v1  ;;  %p294_p4 = pnand %p293_p3, %p287_p0 }
  0x14   :  { %262 = vmatpush3.bf16.msra.mxu1 %v282_v9 }
  0x15   :  { %263 = vmatprep.subr.bf16.mxu1 %v308_v1 }
  0x18   :  { %264 = vmatpush3.bf16.msra.mxu1 %v283_v10 }
  0x19   :  { %265 = vmatprep.subr.bf16.mxu1 %v308_v1 }
  0x1c   :  { %266 = vmatpush3.bf16.msra.mxu1 %v284_v11 }
  0x1d   :  { %267 = vmatprep.subr.bf16.mxu1 %v308_v1 }
  0x20   :  { %268 = vmatpush3.bf16.msra.mxu1 %v285_v12 }
  0xc9   :  { %v85_v14 = vpop.f32.mrf.mxu0 }
  0xca   :  { %v86_v15 = vadd.f32 %v220_v13, %v85_v14 }
  0xcb   :  { %v251_v16 = vpop.f32.mrf.mxu0 }
  0xcc   :  { %v91_v17 = vmax.f32 %v86_v15, 0.0 }
  0xcd   :  { %v88_v18 = vpop.f32.mrf.mxu0 }
  0xce   :  { %v92_v19 = vpack.c.bf16 %v91_v17, %v91_v17 }
  0xcf   :  { %v252_v20 = vpop.f32.mrf.mxu0 }
  0xd0   :  { %270 = vmatmul.mubr.bf16.vlgmr.msra.gmra.mxu1 %v92_v19 }
 0x190   :  { %v198_v22 = vpop.f32.mrf.mxu1 }
 0x191   :  { %v199_v23 = vadd.f32 %v224_v21, %v198_v22 }
 0x192   :  { %v271_v24 = vpop.f32.mrf.mxu1 }
 0x193   :  { %205 = vst.msk [vmem:[#allocation2] sm:$0xff] %vm204_vm2, %v199_v23 }
 0x194   :  { %v201_v25 = vpop.f32.mrf.mxu1 }
 0x195   :  { %297 = shalt.err (!%p294_p4)
}
 0x196   :  { %215 = dma.vmem_to_hbm [thread:$0]  %s213_s18, 128, %s388_s5, [#allocation3]   ;;  %v272_v26 = vpop.f32.mrf.mxu1 }
 0x197   :  { %306 = dma.done.wait [#allocation3], 128  }
 0x198   :  { %307 = vsyncadd [#allocation3], 4294967168 }
 0x199   :  { %219 = vsyncpa [#allocation3], 1 }

</bundles_post_ra>
